<compile_context>
chip_gen: v7x
topology: tpu7x:2x2x1
jax: 0.10.0
libtpu: 0.0.40
codegen_flags: <defaults>
</compile_context>

<pallas_src>
import jax
import jax.numpy as jnp
from jax.experimental import pallas as pl
from jax.experimental.pallas import tpu as pltpu


def _destandardize_kernel(x_ref, std_ref, mean_ref, o_ref):
    # y = x * std + mean; std/mean are (1, df) and broadcast over the row block.
    o_ref[...] = x_ref[...] * std_ref[...] + mean_ref[...]


def _pick_feature_block(d):
    """Lane-aligned divisor of d if possible, else the whole feature axis."""
    if d % 128 == 0:
        for cand in (2048, 1024, 512, 256, 128):
            if d % cand == 0:
                return cand
    # Small / unaligned feature dim: use the full axis (block dim == array dim
    # is allowed).  Ragged-lane stores are masked, but this avoids padding x.
    return d


def destandardize(x, mean, std, *, max_block_rows=1024):
    """y = x * std + mean.

    x:    [N, D]
    mean: scalar, [D] or [1, D]
    std:  scalar, [D] or [1, D]
    """
    x = jnp.asarray(x)
    n, d = x.shape
    dtype = x.dtype
    mean = jnp.broadcast_to(jnp.asarray(mean, dtype).reshape(1, -1), (1, d))
    std = jnp.broadcast_to(jnp.asarray(std, dtype).reshape(1, -1), (1, d))

    itemsize = jnp.dtype(dtype).itemsize
    df = _pick_feature_block(d)

    # Row block: biggest that keeps double-buffered in+out tiles well within
    # the scoped-VMEM default (budget ~8 MiB => 2*2*tb*df*itemsize <= budget).
    vmem_budget = 8 * 1024 * 1024
    tb = max(8, (vmem_budget // (4 * df * itemsize)) // 8 * 8)
    tb = min(tb, max_block_rows)
    if n < tb:
        tb = n if n < 8 else (n // 8) * 8  # full-dim block ok when n < 8

    grid = (pl.cdiv(n, tb), d // df)

    flops = 2 * n * d  # one mul + one add per element
    bytes_accessed = itemsize * (2 * n * d + 2 * d)

    out = pl.pallas_call(
        _destandardize_kernel,
        out_shape=jax.ShapeDtypeStruct((n, d), dtype),
        grid_spec=pltpu.PrefetchScalarGridSpec(
            num_scalar_prefetch=0,
            grid=grid,
            in_specs=[
                pl.BlockSpec((tb, df), lambda i, j: (i, j)),  # x: tiled
                pl.BlockSpec((1, df), lambda i, j: (0, j)),   # std: resident
                pl.BlockSpec((1, df), lambda i, j: (0, j)),   # mean: resident
            ],
            out_specs=pl.BlockSpec((tb, df), lambda i, j: (i, j)),
        ),
        compiler_params=pltpu.CompilerParams(
            dimension_semantics=("parallel", "parallel"),
        ),
        cost_estimate=pl.CostEstimate(
            flops=flops, transcendentals=0, bytes_accessed=bytes_accessed),
    )(x, std, mean)

    return out


def reference_forward(x, mean, std):
    return x * std.reshape(1, -1) + mean.reshape(1, -1)


if __name__ == "__main__":
    key = jax.random.PRNGKey(0)
    k1, k2, k3, k4 = jax.random.split(key, 4)

    # Small, deliberately non-aligned shape (exercises partial-block masking
    # on rows and the full-feature-axis block path).
    x_small = jax.random.normal(k1, (10, 24), jnp.float32)
    mean = jax.random.normal(k2, (24,), jnp.float32)
    std = jax.random.uniform(k3, (24,), jnp.float32, minval=0.5, maxval=2.0)

    out_small = jax.block_until_ready(destandardize(x_small, mean, std))
    ref_small = reference_forward(x_small, mean, std)
    assert out_small.shape == x_small.shape
    assert jnp.allclose(out_small, ref_small, atol=1e-6, rtol=1e-6)

    # Lane-aligned shape that exercises the multi-block pipelined grid.
    x_big = jax.random.normal(k4, (512, 256), jnp.float32)
    mean_big = jnp.linspace(-1.0, 1.0, 256, dtype=jnp.float32)
    std_big = jnp.linspace(0.5, 1.5, 256, dtype=jnp.float32)

    out_big = jax.block_until_ready(
        destandardize(x_big, mean_big, std_big, max_block_rows=128))
    ref_big = reference_forward(x_big, mean_big, std_big)
    assert out_big.shape == x_big.shape
    assert jnp.allclose(out_big, ref_big, atol=1e-6, rtol=1e-6)

    print("KERNEL_OK")
</pallas_src>

<mosaic_0001>
module attributes {stable_mosaic.version = 11 : i64} {
  func.func @_destandardize_kernel(%arg0: i32, %arg1: i32, %arg2: memref<8x24xf32, #tpu.memory_space<vmem>>, %arg3: memref<1x24xf32, #tpu.memory_space<vmem>>, %arg4: memref<1x24xf32, #tpu.memory_space<vmem>>, %arg5: memref<8x24xf32, #tpu.memory_space<vmem>>) attributes {dimension_semantics = [#tpu.dimension_semantics<parallel>, #tpu.dimension_semantics<parallel>], iteration_bounds = array<i64: 2, 1>, scalar_prefetch = 0 : i64, scratch_operands = 0 : i64, tpu.core_type = #tpu.core_type<tc>, window_params = [{transform_indices = @transform_0, window_bounds = array<i64: 8, 24>}, {transform_indices = @transform_1, window_bounds = array<i64: 1, 24>}, {transform_indices = @transform_2, window_bounds = array<i64: 1, 24>}, {transform_indices = @transform_3, window_bounds = array<i64: 8, 24>}]} {
    %c0 = arith.constant 0 : index
    %c0_0 = arith.constant 0 : index
    %0 = vector.load %arg2[%c0, %c0_0] : memref<8x24xf32, #tpu.memory_space<vmem>>, vector<8x24xf32>
    %c0_1 = arith.constant 0 : index
    %c0_2 = arith.constant 0 : index
    %1 = vector.load %arg3[%c0_1, %c0_2] : memref<1x24xf32, #tpu.memory_space<vmem>>, vector<1x24xf32>
    %2 = vector.broadcast %1 : vector<1x24xf32> to vector<8x24xf32>
    %3 = arith.mulf %0, %2 : vector<8x24xf32>
    %c0_3 = arith.constant 0 : index
    %c0_4 = arith.constant 0 : index
    %4 = vector.load %arg4[%c0_3, %c0_4] : memref<1x24xf32, #tpu.memory_space<vmem>>, vector<1x24xf32>
    %5 = vector.broadcast %4 : vector<1x24xf32> to vector<8x24xf32>
    %6 = arith.addf %3, %5 : vector<8x24xf32>
    %c0_5 = arith.constant 0 : index
    %c0_6 = arith.constant 0 : index
    %7 = vector.load %arg5[%c0_5, %c0_6] : memref<8x24xf32, #tpu.memory_space<vmem>>, vector<8x24xf32>
    tpu.vector_store %arg5[%c0_5, %c0_6], %6 {strides = array<i32>} : memref<8x24xf32, #tpu.memory_space<vmem>>, vector<8x24xf32>,
    return
  }
  func.func @transform_0(%arg0: i32, %arg1: i32) -> (i32, i32) {
    %c0_i32 = arith.constant 0 : i32
    return %arg0, %arg1 : i32, i32
  }
  func.func @transform_1(%arg0: i32, %arg1: i32) -> (i32, i32) {
    %c0_i32 = arith.constant 0 : i32
    %c0_i32_0 = arith.constant 0 : i32
    return %c0_i32, %arg1 : i32, i32
  }
  func.func @transform_2(%arg0: i32, %arg1: i32) -> (i32, i32) {
    %c0_i32 = arith.constant 0 : i32
    %c0_i32_0 = arith.constant 0 : i32
    return %c0_i32, %arg1 : i32, i32
  }
  func.func @transform_3(%arg0: i32, %arg1: i32) -> (i32, i32) {
    %c0_i32 = arith.constant 0 : i32
    return %arg0, %arg1 : i32, i32
  }
}

</mosaic_0001>

<bundles_post_ra>
// kernel: tpu_custom_call.1
= control target key start
LH: loop header
LB: loop body
LE: loop exit
PB: predicated region body
PF: predicated region fallthrough
CT: control target
= control target key end

     0   :  { %8 = vsyncpa [#allocation3], 0  ;;  %s762_s0 = inlined_call_operand.hbm [shape: f32[10,24], index: 0, kind: input, shape index: {}]   ;;  %s763_s1 = inlined_call_operand.vmem [shape: f32[1,24], index: 1, kind: input, shape index: {}]   ;;  %s764_s2 = inlined_call_operand.vmem [shape: f32[1,24], index: 2, kind: input, shape index: {}]   ;;  %s765_s3 = inlined_call_operand.hbm [shape: f32[10,24], index: 3, kind: output, shape index: {}]  }
   0x1   :  { %10 = vsyncpa [#allocation3 + $0x1], 0 }
   0x2   :  { %11 = vsyncpa [#allocation4], 0 }
   0x3   :  { %13 = vsyncpa [#allocation4 + $0x1], 0  ;;  %s584_s12 = smov 0   ;;  %s586_s13 = smov 0  }
   0x4   :  { %s588_s14 = smov 0   ;;  %s590_s15 = smov 0  }
   0x5   :  { %s592_s16 = smov 0   ;;  %s594_s17 = smov 0  }
   0x6 LB: > { %s369_s18 = sadd.s32 4294967295, %s560_s17   ;;  %s370_s19 = sadd.s32 4294967294, %s560_s17   ;;  %s560_s17 = sphi %s594_s17, %s19_s17   ;;  %s556_s16 = sphi %s592_s16, %s781_s16   ;;  %s552_s15 = sphi %s590_s15, %s780_s15   ;;  %s548_s14 = sphi %s588_s14, %s779_s14   ;;  %s544_s13 = sphi %s586_s13, %s778_s13   ;;  %s540_s12 = sphi %s584_s12, %s777_s12  }
   0x7   : > { %s31_s20 = sadd.s32 1, %s556_s16  ;;  %s40_s21 = sadd.s32 1, %s548_s14 }
   0x8   : > { %p33_p0 = scmp.ge.s32.totalorder %s31_s20, 2  ;;  %p47_p1 = scmp.ne.s32.totalorder %s548_s14, %s544_s13 }
   0x9   : > { %p48_p2 = scmp.eq.s32.totalorder %s560_s17, 0  ;;  %p53_p3 = scmp.ne.s32.totalorder %s544_s13, %s540_s12 }
   0xa   : > { %s783_s20 = smov (%p33_p0, %s31_s20), 0  ;;  %p54_p5 = scmp.eq.s32.totalorder %s369_s18, 0 }
   0xb   : > { %p625_p4 = por %p48_p2, %p47_p1  ;;  %s35_s23 = ssub.s32 %s556_s16, %s783_s20 }
   0xc   : > { %p131_p6 = scmp.eq.s32.totalorder %s369_s18, 1  ;;  %p38_p7 = scmp.eq.s32.totalorder %s35_s23, 0 }
   0xd   : > { %p631_p8 = por %p54_p5, %p53_p3  ;;  %p137_p10 = scmp.eq.s32.totalorder %s370_s19, 1 }
   0xe   : > { %p635_p9 = por %p131_p6, %p47_p1  ;;  %p398_p13 = scmp.lt.s32.totalorder %s560_s17, 2 }
   0xf   : > { %s640_s26 = scalar_select %p38_p7, %s548_s14, %s40_s21  }
  0x10   : > { %s769_s25 = scalar_select %p635_p9, 1, 0 }
  0x11   : > { %p642_p11 = por %p137_p10, %p53_p3  ;;  %s169_s28 = sand.u32 1, %s548_s14  }
  0x12   : > { %s375_s29 = sshll.u32 %s169_s28, 3  ;;  %s376_s30 = sshll.u32 %s556_s16, 7 }
  0x13   : > { %s770_s27 = scalar_select %p642_p11, 1, 0 }
  0x14   : > { %s653_s6 = scalar_lea.hbm %s762_s0, %s376_s30  ;;  %s173_s7 = scalar_lea.vmem [#allocation2], %s375_s29 }
  0x15   : > { %s181_s8 = sshll.u32 %s173_s7, 4  ;;  %p659_p0 = pnand %p398_p13, %p625_p4  ;;  %s655_s8 = int_to_ptr.vmem [resolvable:$true] %s181_s8 }
  0x16   : > { %s170_s10 = scalar_lea.sflag [#allocation3], %s169_s28  ;;  %s448_s11 = scalar_lea.hbm %s653_s6, 128 }
  0x17   : > { %p449_p3 = scmp.ne.s32.totalorder %s653_s6, %s448_s11  ;;  %p450_p5 = pneg %p659_p0 }
  0x18   : > { %s453_s21 = scalar_lea.hbm %s762_s0, 256  ;;  %p454_p4 = scmp.lt.u32.totalorder %s653_s6, %s762_s0 }
  0x19   : > { %p451_p6 = pnand %p450_p5, %p449_p3  ;;  %p455_p10 = scmp.lt.u32.totalorder %s453_s21, %s448_s11 }
  0x1a   : > { %p457_p12 = scmp.lt.u32.totalorder %s448_s11, %s653_s6 }
  0x1b   : > { %p452_p7 = pneg %p451_p6  ;;  %p456_p13 = por %p455_p10, %p454_p4 }
  0x1d   : > { %p458_p1 = por %p457_p12, %p456_p13 }
  0x1f   : > { %p459_p2 = pnand %p458_p1, %p452_p7 }
  0x21   : > { %462 = shalt.err (!%p459_p2)
}
  0x22   : > { %s463_s28 = scalar_lea.vmem %s655_s8, 128  ;;  %s562_s29 = smov [#allocation2]  }
  0x23   : > { %p464_p3 = scmp.ne.s32.totalorder %s655_s8, %s463_s28  ;;  %s468_s30 = sshll.u32 %s562_s29, 4  ;;  %s469_s30 = int_to_ptr.vmem [resolvable:$false] %s468_s30 }
  0x24   : > { %s470_s4 = scalar_lea.vmem %s469_s30, 256  ;;  %p471_p9 = scmp.lt.s32.totalorder %s655_s8, %s469_s30 }
  0x25   : > { %p466_p6 = pnand %p464_p3, %p450_p5  ;;  %p472_p4 = scmp.lt.s32.totalorder %s470_s4, %s463_s28 }
  0x27   : > { %p467_p11 = pneg %p466_p6  ;;  %p473_p10 = por %p472_p4, %p471_p9 }
  0x29   : > { %p474_p12 = pnand %p473_p10, %p467_p11 }
  0x2b   : > { %477 = shalt.err (!%p474_p12)
}
  0x2c   : > { %393 = dma.hbm_to_vmem [thread:$0]  (!%p659_p0), %s653_s6, 128, %s655_s8, %s170_s10  }
  0x2d   : > { %p772_p1 = scmp.lt.s32.totalorder %s560_s17, 3  ;;  %p773_p2 = scmp.ge.s32.totalorder %s560_s17, 1 }
  0x2f   : > { %p187_p5 = pnand %p773_p2, %p772_p1 }
  0x30   : > { %s695_s5 = sand.u32 (!%p187_p5), 1, %s544_s13  }
  0x31   : > { %190 = sbr.rel (%p187_p5) target bundleno = 83 (0x53), region = 32  ;;  %s378_s7 = sshll.u32 (!%p187_p5), %s695_s5, 3 }
  0x32   : > { %s193_s11 = scalar_lea.sflag (!%p187_p5), [#allocation3], %s695_s5  ;;  %s196_s18 = scalar_lea.vmem (!%p187_p5), [#allocation2], %s378_s7 }
  0x38   : > { %531 = dma.done.wait (%p631_p8), %s193_s11, 128  }
  0x39   : > { %533 = vsyncadd (%p631_p8), %s193_s11, 4294967168  ;;  %s224_s6 = scalar_lea.vmem [#allocation5], %s378_s7  ;;  %v231_v0 = vld [vmem:[%s196_s18] sm:$0xff]  ;;  %s383_s22 = sshll.u32 %s552_s15, 7  ;;  %vm248_vm0 = vcmask 195584  }
  0x3a   : > { %s265_s8 = sshll.u32 %s224_s6, 4  ;;  %v380_v1 = vld [vmem:[%s763_s1] ss:$0 sm:$0xff]  ;;  %s715_s28 = scalar_lea.hbm %s765_s3, %s383_s22  ;;  %s710_s8 = int_to_ptr.vmem [resolvable:$true] %s265_s8 }
  0x3b   : > { %v381_v2 = vld [vmem:[%s764_s2] ss:$0 sm:$0xff]  ;;  %v239_v3 = vmul.f32 %v380_v1, %v231_v0  ;;  %s251_s29 = scalar_lea.sflag [#allocation4], %s695_s5  ;;  %s478_s30 = scalar_lea.vmem %s710_s8, 128 }
  0x3c   : > { %p479_p8 = scmp.ne.s32.totalorder %s710_s8, %s478_s30  ;;  %p774_p9 = scmp.ne.s32.totalorder %s769_s25, 0 }
  0x3d   : > { %v247_v4 = vadd.f32 %v381_v2, %v239_v3  ;;  %s563_s15 = smov [#allocation5]  }
  0x3e   : > { %p480_p11 = pnand %p479_p8, %p774_p9  ;;  %s482_s4 = sshll.u32 %s563_s15, 4  ;;  %s483_s4 = int_to_ptr.vmem [resolvable:$false] %s482_s4 }
  0x3f   : > { %249 = vst.msk [vmem:[%s224_s6] sm:$0xff] %vm248_vm0, %v247_v4  ;;  %s484_s7 = scalar_lea.vmem %s483_s4, 256  ;;  %p485_p7 = scmp.lt.s32.totalorder %s710_s8, %s483_s4 }
  0x40   : > { %p481_p0 = pneg %p480_p11  ;;  %p486_p13 = scmp.lt.s32.totalorder %s484_s7, %s478_s30 }
  0x42   : > { %p487_p3 = por %p486_p13, %p485_p7 }
  0x44   : > { %p488_p6 = pnand %p487_p3, %p481_p0 }
  0x46   : > { %491 = shalt.err (!%p488_p6)
}
  0x47   : > { %s492_s5 = scalar_lea.hbm %s715_s28, 128  ;;  %s496_s6 = scalar_lea.hbm %s765_s3, 256 }
  0x48   : > { %p493_p4 = scmp.ne.s32.totalorder %s715_s28, %s492_s5  ;;  %p497_p1 = scmp.lt.u32.totalorder %s715_s28, %s765_s3 }
  0x49   : > { %p498_p2 = scmp.lt.u32.totalorder %s496_s6, %s492_s5  ;;  %p500_p8 = scmp.lt.u32.totalorder %s492_s5, %s715_s28 }
  0x4a   : > { %p494_p10 = pnand %p493_p4, %p774_p9 }
  0x4b   : > { %p499_p5 = por %p498_p2, %p497_p1 }
  0x4c   : > { %p495_p12 = pneg %p494_p10 }
  0x4d   : > { %p501_p11 = por %p500_p8, %p499_p5 }
  0x4f   : > { %p502_p0 = pnand %p501_p11, %p495_p12 }
  0x51   : > { %505 = shalt.err (!%p502_p0)
}
  0x52   : > { %388 = dma.vmem_to_hbm [thread:$0]  (%p774_p9), %s710_s8, 128, %s715_s28, %s251_s29  }
  0x53 PF: > { %s277_s19 = sand.u32 1, %s540_s12   ;;  %p775_p7 = scmp.ne.s32.totalorder %s770_s27, 0 }
  0x54   : > { %p776_p13 = scmp.ge.s32.totalorder %s560_s17, 2  ;;  %s278_s21 = scalar_lea.sflag [#allocation4], %s277_s19 }
  0x56   : > { %p395_p3 = pnand %p776_p13, %p775_p7 }
  0x58   : > { %535 = dma.done.wait (!%p395_p3), %s278_s21, 128  }
  0x59   : > { %537 = vsyncadd (!%p395_p3), %s278_s21, 4294967168  ;;  %s19_s17 = sadd.s32 1, %s560_s17   ;;  %s777_s12 = smov %s544_s13 }
  0x5a   : > { %p16_p6 = scmp.ge.s32.totalorder %s19_s17, 4   ;;  %s778_s13 = smov %s548_s14 }
  0x5b   : > { %s779_s14 = smov %s640_s26  ;;  %s780_s15 = smov %s556_s16 }
  0x5c   : > { %s781_s16 = smov %s783_s20  ;;  %18 = sbr.rel (!%p16_p6) target bundleno = 6 (0x6), region = 83 }
  0x63   :  { %283 = vsyncpa [#allocation3], 1 }
  0x64   :  { %285 = vsyncpa [#allocation3 + $0x1], 1 }
  0x65   :  { %286 = vsyncpa [#allocation4], 1 }
  0x66   :  { %288 = vsyncpa [#allocation4 + $0x1], 1 }

</bundles_post_ra>
